<compile_context>
chip_gen: v5e
topology: v5e:2x2
jax: 0.10.0
libtpu: 0.0.40
codegen_flags: <defaults>
</compile_context>

<pallas_src>
import functools

import jax
import jax.numpy as jnp
from jax.experimental import pallas as pl
from jax.experimental.pallas import tpu as pltpu

EPS = 1e-5
LANE = 128


# ---------------------------------------------------------------------------
# Fused kernel: whole MLP in one body (all refs are full arrays in VMEM)
# ---------------------------------------------------------------------------
def make_fused_mlp_kernel(n_hidden):
    def kernel(x_ref, *refs):
        o_ref = refs[-1]
        h = x_ref[...]
        for i in range(n_hidden):
            w = refs[2 * i][...]          # (in, out)  -- BN-folded, pre-transposed
            b = refs[2 * i + 1][...]      # (1, out)
            h = jnp.dot(h, w, preferred_element_type=jnp.float32) + b
            h = jnp.maximum(h, 0.0)
            # Dropout: identity (eval mode)
        wo = refs[2 * n_hidden][...]      # (prev, 128)  -- zero-padded output lanes
        bo = refs[2 * n_hidden + 1][...]  # (1, 128)
        y = jnp.dot(h, wo, preferred_element_type=jnp.float32) + bo
        o_ref[...] = jax.nn.sigmoid(y)
    return kernel


# ---------------------------------------------------------------------------
# Parameter prep (done once, outside jit): fold BN, transpose, pad output lanes
# ---------------------------------------------------------------------------
def prepare_params(params):
    """params: list of dicts (PyTorch layout).  Returns flat tuple of kernel arrays."""
    packed = []
    for p in params[:-1]:
        scale = p["gamma"] / jnp.sqrt(p["var"] + EPS)             # (H,)
        w_fold = (p["w"] * scale[:, None]).T.astype(jnp.float32)  # (in, H)
        b_fold = ((p["b"] - p["mean"]) * scale + p["beta"]).reshape(1, -1).astype(jnp.float32)
        packed.extend([w_fold, b_fold])

    w_o = params[-1]["w"]                 # (out, prev)
    b_o = params[-1]["b"]                 # (out,)
    out_size, prev = w_o.shape
    padded_out = max(LANE, ((out_size + LANE - 1) // LANE) * LANE)
    w_o_t = jnp.zeros((prev, padded_out), jnp.float32).at[:, :out_size].set(w_o.T)
    b_o_p = jnp.zeros((1, padded_out), jnp.float32).at[0, :out_size].set(b_o)
    packed.extend([w_o_t, b_o_p])
    return tuple(packed)


# ---------------------------------------------------------------------------
# Forward: single fused, gridless pallas_call
# ---------------------------------------------------------------------------
@functools.partial(jax.jit, static_argnames=("n_hidden", "output_size"))
def forward_pallas(x, packed, *, n_hidden, output_size):
    B = x.shape[0]
    padded_out = packed[-1].shape[1]
    vmem = pl.BlockSpec(memory_space=pltpu.MemorySpace.VMEM)
    out = pl.pallas_call(
        make_fused_mlp_kernel(n_hidden),
        out_shape=jax.ShapeDtypeStruct((B, padded_out), jnp.float32),
        in_specs=[vmem] * (1 + len(packed)),
        out_specs=vmem,
    )(x, *packed)
    return out[:, :output_size]


# ---------------------------------------------------------------------------
# Deterministic parameter init (PyTorch-style) + pure-JAX reference
# ---------------------------------------------------------------------------
def init_params(key, input_size, hidden_sizes, output_size):
    params = []
    prev = input_size
    for h in hidden_sizes:
        key, kw, kb = jax.random.split(key, 3)
        bound = 1.0 / jnp.sqrt(prev)
        w = jax.random.uniform(kw, (h, prev), jnp.float32, -bound, bound)  # PyTorch [out, in]
        b = jax.random.uniform(kb, (h,), jnp.float32, -bound, bound)
        # BatchNorm1d: gamma=1, beta=0; perturb running stats so BN is non-trivial.
        key, km, kv = jax.random.split(key, 3)
        gamma = jnp.ones((h,), jnp.float32)
        beta = jnp.zeros((h,), jnp.float32)
        mean = 0.1 * jax.random.normal(km, (h,), jnp.float32)
        var = 1.0 + 0.1 * jax.random.uniform(kv, (h,), jnp.float32)
        params.append(dict(w=w, b=b, gamma=gamma, beta=beta, mean=mean, var=var))
        prev = h
    key, kw, kb = jax.random.split(key, 3)
    bound = 1.0 / jnp.sqrt(prev)
    w = jax.random.uniform(kw, (output_size, prev), jnp.float32, -bound, bound)
    b = jax.random.uniform(kb, (output_size,), jnp.float32, -bound, bound)
    params.append(dict(w=w, b=b))
    return params


def forward_reference(x, params):
    h = x
    for p in params[:-1]:
        y = h @ p["w"].T + p["b"]
        y = (y - p["mean"]) / jnp.sqrt(p["var"] + EPS) * p["gamma"] + p["beta"]
        h = jnp.maximum(y, 0.0)
    y = h @ params[-1]["w"].T + params[-1]["b"]
    return jax.nn.sigmoid(y)


if __name__ == "__main__":
    key = jax.random.PRNGKey(0)
    k_param, k_x = jax.random.split(key)

    # Heart-disease-like configuration at small shapes.
    batch = 8
    input_size = 13
    hidden_sizes = [32, 16]
    output_size = 1

    params = init_params(k_param, input_size, hidden_sizes, output_size)
    x = jax.random.normal(k_x, (batch, input_size), jnp.float32)

    packed = prepare_params(params)   # BN folded, transposed, output-padded (once)

    out = forward_pallas(x, packed, n_hidden=len(hidden_sizes), output_size=output_size)
    out = jax.block_until_ready(out)

    ref = forward_reference(x, params)
    assert out.shape == (batch, output_size), out.shape
    assert jnp.allclose(out, ref, atol=1e-5, rtol=1e-5), (out, ref)

    print("KERNEL_OK")
</pallas_src>

<mosaic_0001>
module attributes {stable_mosaic.version = 11 : i64} {
  func.func @kernel(%arg0: memref<8x13xf32, #tpu.memory_space<vmem>>, %arg1: memref<13x32xf32, #tpu.memory_space<vmem>>, %arg2: memref<1x32xf32, #tpu.memory_space<vmem>>, %arg3: memref<32x16xf32, #tpu.memory_space<vmem>>, %arg4: memref<1x16xf32, #tpu.memory_space<vmem>>, %arg5: memref<16x128xf32, #tpu.memory_space<vmem>>, %arg6: memref<1x128xf32, #tpu.memory_space<vmem>>, %arg7: memref<8x128xf32, #tpu.memory_space<vmem>>) attributes {dimension_semantics = [], scalar_prefetch = 0 : i64, scratch_operands = 0 : i64, tpu.core_type = #tpu.core_type<tc>} {
    %c0 = arith.constant 0 : index
    %c0_0 = arith.constant 0 : index
    %0 = vector.load %arg0[%c0, %c0_0] : memref<8x13xf32, #tpu.memory_space<vmem>>, vector<8x13xf32>
    %c0_1 = arith.constant 0 : index
    %c0_2 = arith.constant 0 : index
    %1 = vector.load %arg1[%c0_1, %c0_2] : memref<13x32xf32, #tpu.memory_space<vmem>>, vector<13x32xf32>
    %c0_3 = arith.constant 0 : index
    %c0_4 = arith.constant 0 : index
    %2 = vector.load %arg2[%c0_3, %c0_4] : memref<1x32xf32, #tpu.memory_space<vmem>>, vector<1x32xf32>
    %cst = arith.constant dense<0.000000e+00> : vector<8x32xf32>
    %3 = tpu.matmul %0, %1, %cst {dimension_numbers = #tpu.dot_dimension_numbers<[1], [0], [0], [1], [0, 0, 1, 1], [], []>} : vector<8x13xf32>, vector<13x32xf32>, vector<8x32xf32> -> vector<8x32xf32>
    %4 = vector.broadcast %2 : vector<1x32xf32> to vector<8x32xf32>
    %5 = arith.addf %3, %4 : vector<8x32xf32>
    %cst_5 = arith.constant 0.000000e+00 : f32
    %6 = vector.broadcast %cst_5 : f32 to vector<8x32xf32>
    %7 = arith.maximumf %5, %6 : vector<8x32xf32>
    %c0_6 = arith.constant 0 : index
    %c0_7 = arith.constant 0 : index
    %8 = vector.load %arg3[%c0_6, %c0_7] : memref<32x16xf32, #tpu.memory_space<vmem>>, vector<32x16xf32>
    %c0_8 = arith.constant 0 : index
    %c0_9 = arith.constant 0 : index
    %9 = vector.load %arg4[%c0_8, %c0_9] : memref<1x16xf32, #tpu.memory_space<vmem>>, vector<1x16xf32>
    %cst_10 = arith.constant dense<0.000000e+00> : vector<8x16xf32>
    %10 = tpu.matmul %7, %8, %cst_10 {dimension_numbers = #tpu.dot_dimension_numbers<[1], [0], [0], [1], [0, 0, 1, 1], [], []>} : vector<8x32xf32>, vector<32x16xf32>, vector<8x16xf32> -> vector<8x16xf32>
    %11 = vector.broadcast %9 : vector<1x16xf32> to vector<8x16xf32>
    %12 = arith.addf %10, %11 : vector<8x16xf32>
    %cst_11 = arith.constant 0.000000e+00 : f32
    %13 = vector.broadcast %cst_11 : f32 to vector<8x16xf32>
    %14 = arith.maximumf %12, %13 : vector<8x16xf32>
    %c0_12 = arith.constant 0 : index
    %c0_13 = arith.constant 0 : index
    %15 = vector.load %arg5[%c0_12, %c0_13] : memref<16x128xf32, #tpu.memory_space<vmem>>, vector<16x128xf32>
    %c0_14 = arith.constant 0 : index
    %c0_15 = arith.constant 0 : index
    %16 = vector.load %arg6[%c0_14, %c0_15] : memref<1x128xf32, #tpu.memory_space<vmem>>, vector<1x128xf32>
    %cst_16 = arith.constant dense<0.000000e+00> : vector<8x128xf32>
    %17 = tpu.matmul %14, %15, %cst_16 {dimension_numbers = #tpu.dot_dimension_numbers<[1], [0], [0], [1], [0, 0, 1, 1], [], []>} : vector<8x16xf32>, vector<16x128xf32>, vector<8x128xf32> -> vector<8x128xf32>
    %18 = vector.broadcast %16 : vector<1x128xf32> to vector<8x128xf32>
    %19 = arith.addf %17, %18 : vector<8x128xf32>
    %20 = arith.negf %19 : vector<8x128xf32>
    %21 = math.exp %20 : vector<8x128xf32>
    %cst_17 = arith.constant 1.000000e+00 : f32
    %22 = vector.broadcast %cst_17 : f32 to vector<8x128xf32>
    %23 = arith.addf %22, %21 : vector<8x128xf32>
    %24 = arith.divf %22, %23 : vector<8x128xf32>
    %c0_18 = arith.constant 0 : index
    %c0_19 = arith.constant 0 : index
    %25 = vector.load %arg7[%c0_18, %c0_19] : memref<8x128xf32, #tpu.memory_space<vmem>>, vector<8x128xf32>
    tpu.vector_store %arg7[%c0_18, %c0_19], %24 {strides = array<i32>} : memref<8x128xf32, #tpu.memory_space<vmem>>, vector<8x128xf32>,
    return
  }
}

</mosaic_0001>

<bundles_post_ra>
// kernel: forward_pallas.1
= control target key start
LH: loop header
LB: loop body
LE: loop exit
PB: predicated region body
PF: predicated region fallthrough
CT: control target
= control target key end

     0   :  { %vm37_vm0 = vcmask 1044480   ;;  %vm33_vm1 = vcmask 105472   ;;  %vm70_vm2 = vcmask 261120   ;;  %vm101_vm3 = vcmask 130048   ;;  %s240_s1 = inlined_call_operand.vmem [shape: f32[13,32], index: 1, kind: input, shape index: {}]   ;;  %s241_s0 = inlined_call_operand.vmem [shape: f32[8,13], index: 0, kind: input, shape index: {}]   ;;  %s242_s3 = inlined_call_operand.vmem [shape: f32[32,16], index: 3, kind: input, shape index: {}]   ;;  %s243_s2 = inlined_call_operand.vmem [shape: f32[1,32], index: 2, kind: input, shape index: {}]   ;;  %s244_s4 = inlined_call_operand.vmem [shape: f32[1,16], index: 4, kind: input, shape index: {}]   ;;  %s245_s6 = inlined_call_operand.vmem [shape: f32[1,128], index: 6, kind: input, shape index: {}]   ;;  %s246_s5 = inlined_call_operand.vmem [shape: f32[16,128], index: 5, kind: input, shape index: {}]   ;;  %s247_s7 = inlined_call_operand.vmem [shape: f32[8,128], index: 7, kind: output, shape index: {}]  }
   0x1   :  { %v28_v0 = vld [vmem:[%s240_s1 + $0x8] sm:$0x1f]  ;;  %v27_v1 = vld [vmem:[%s240_s1] sm:$0xff]  ;;  %v65_v3 = vld [vmem:[%s242_s3 + $0x18] sm:$0xff] }
   0x2   :  { %149 = vmatpush.msk.msra.mxu0 %vm37_vm0, %v28_v0  ;;  %v26_v2 = vld [vmem:[%s241_s0] sm:$0xff]  ;;  %86 = vmatpush.msra.mxu1 %v65_v3  ;;  %v64_v4 = vld [vmem:[%s242_s3 + $0x10] sm:$0xff]  ;;  %v63_v5 = vld [vmem:[%s242_s3 + $0x8] sm:$0xff] }
   0x3   :  { %v62_v6 = vld [vmem:[%s242_s3] sm:$0xff]  ;;  %v96_v11 = vld [vmem:[%s246_s5 + $0x8] sm:$0xff] }
   0x4   :  { %56 = vmatpush.msra.mxu0 %v27_v1  ;;  %87 = vmatpush.msra.mxu1 %v64_v4  ;;  %v154_v7 = vld [vmem:[%s243_s2] ss:$0 sm:$0xff] }
   0x5   :  { %150 = vmatmul.msk.f32.vlgmr.msra.gmra.mxu0 %vm33_vm1, %v26_v2  ;;  %119 = vmatpush.msra.mxu2 %v96_v11  ;;  %v95_v12 = vld [vmem:[%s246_s5] sm:$0xff] }
   0x6   :  { %88 = vmatpush.msra.mxu1 %v63_v5  ;;  %v155_v13 = vld [vmem:[%s244_s4] ss:$0 sm:$0xff] }
   0x7   :  { %120 = vmatpush.msra.mxu2 %v95_v12  ;;  %v156_v17 = vld [vmem:[%s245_s6] ss:$0 sm:$0xff] }
   0x8   :  { %89 = vmatpush.msra.mxu1 %v62_v6 }
  0x82   :  { %v58_v8 = vpop.f32.mrf.mxu0 }
  0x83   :  { %v59_v9 = vadd.f32 %v154_v7, %v58_v8 }
  0x85   :  { %v61_v10 = vmax.f32 %v59_v9, 0.0 }
  0x87   :  { %151 = vmatmul.msk.f32.vlgmr.msra.gmra.mxu1 %vm70_vm2, %v61_v10 }
 0x104   :  { %v91_v14 = vpop.f32.mrf.mxu1 }
 0x105   :  { %v92_v15 = vadd.f32 %v155_v13, %v91_v14 }
 0x107   :  { %v94_v16 = vmax.f32 %v92_v15, 0.0 }
 0x109   :  { %152 = vmatmul.msk.f32.vlgmr.msra.gmra.mxu2 %vm101_vm3, %v94_v16 }
 0x18c   :  { %v122_v18 = vpop.f32.mrf.mxu2 }
 0x18d   :  { %v123_v19 = vadd.f32 %v156_v17, %v122_v18 }
 0x18f   :  { %v153_v20 = vmul.f32 -1.442695, %v123_v19 }
 0x191   :  { %157 = vpow2.f32 %v153_v20 }
 0x197   :  { %v158_v21 = vpop.eup %157 }
 0x198   :  { %v128_v22 = vadd.f32 1.0, %v158_v21 }
 0x19a   :  { %159 = vrcp.f32 %v128_v22  ;;  %v140_v26 = vand.u32 2147483648, %v128_v22  ;;  %v138_v28 = vand.u32 2147483647, %v128_v22  ;;  %vm134_vm5 = vweird.f32 %v128_v22 }
 0x19c   :  { %v141_v30 = vor.u32 1.1754944e-38, %v140_v26  ;;  %vm139_vm7 = vcmp.eq.f32.partialorder %v138_v28, 8.507059e+37 }
 0x1a0   :  { %v160_v23 = vpop.eup %159 }
 0x1a1   :  { %v130_v24 = vmul.f32 %v160_v23, %v128_v22  ;;  %vm135_vm4 = vweird.f32 %v160_v23 }
 0x1a2   :  { %vm136_vm6 = vmor %vm134_vm5, %vm135_vm4 }
 0x1a3   :  { %v131_v25 = vsub.f32 1.0, %v130_v24 }
 0x1a5   :  { %v132_v27 = vmul.f32 %v160_v23, %v131_v25 }
 0x1a7   :  { %v133_v29 = vadd.f32 %v160_v23, %v132_v27 }
 0x1a9   :  { %v137_v31 = vsel %vm136_vm6, %v160_v23, %v133_v29 }
 0x1aa   :  { %v142_v32 = vsel %vm139_vm7, %v141_v30, %v137_v31 }
 0x1ab   :  { %144 = vst [vmem:[%s247_s7] sm:$0xff] %v142_v32 }

</bundles_post_ra>
